<compile_context>
chip_gen: v5e
topology: v5e:2x2
jax: 0.10.0
libtpu: 0.0.40
codegen_flags: <defaults>
</compile_context>

<pallas_src>
import functools

import jax
import jax.numpy as jnp
from jax.experimental import pallas as pl
from jax.experimental.pallas import tpu as pltpu


def _cosine_loss_kernel(target_ref, output_ref, colsum_ref, r_ref, *,
                        tile_rows: int, n_rows: int, ragged: bool):
    """One row tile: partial column-sums of t*o and per-row rsqrt norms."""
    t = target_ref[...].astype(jnp.float32)             # (tile_rows, D)
    o = output_ref[...].astype(jnp.float32)             # (tile_rows, D)

    if ragged:
        # The last tile extends past N rows; the out-of-bounds part of the
        # VMEM buffer holds garbage, so mask it before any arithmetic.
        row0 = pl.program_id(0) * tile_rows
        rows = jax.lax.broadcasted_iota(jnp.int32, (tile_rows, 1), 0) + row0
        valid = rows < n_rows                             # (tile_rows, 1)
        t = jnp.where(valid, t, 0.0)
        o = jnp.where(valid, o, 0.0)

    # Partial column sums of t*o for this row tile, written to this step's own
    # (8, D) output slab (row 0 = data, rows 1..7 = zeros, so the XLA epilogue
    # can just sum everything).  Disjoint outputs per step => "parallel" grid.
    colsum = jnp.sum(t * o, axis=0, keepdims=True)        # (1, D)
    sub = jax.lax.broadcasted_iota(jnp.int32, (8, colsum.shape[1]), 0)
    colsum_ref[...] = jnp.where(sub == 0, colsum, 0.0)    # (8, D)

    # Per-row 1 / (|t_row| * |o_row|).  Two EUP rsqrts (not rsqrt of the
    # product) so the product of squared norms cannot overflow float32.
    t_sq = jnp.sum(t * t, axis=1, keepdims=True)          # (tile_rows, 1)
    o_sq = jnp.sum(o * o, axis=1, keepdims=True)          # (tile_rows, 1)
    r = jax.lax.rsqrt(t_sq) * jax.lax.rsqrt(o_sq)
    if ragged:
        r = jnp.where(valid, r, 0.0)                       # keep inf out of pad
    r_ref[...] = r


def _vmem_input_budget_bytes() -> int:
    """Generation-aware VMEM budget for the streaming (double-buffered) blocks."""
    kind = ""
    try:
        kind = jax.devices()[0].device_kind.lower()
    except Exception:
        pass
    if "v5 lite" in kind or "v5lite" in kind or "v5e" in kind:
        return 16 << 20          # v5e: 16 MiB default scoped VMEM -> stay modest
    if "v7" in kind:
        return 24 << 20          # v7x: only 64 MiB *physical* VMEM -> headroom
    if "v6" in kind:
        return 28 << 20          # v6e: 128 MiB physical / 32 MiB default scoped
    return 20 << 20              # unknown generation: conservative


def _sublane_multiple(itemsize: int) -> int:
    # Packed dtypes pack along sublanes: f32 -> 8, bf16 -> 16, int8/fp8 -> 32.
    return max(8, 32 // max(1, itemsize))


def _pick_tile_rows(n_rows: int, n_cols: int, itemsize: int) -> int:
    """Largest sublane-aligned row tile whose pipeline footprint fits budget."""
    sub = _sublane_multiple(itemsize)
    budget = _vmem_input_budget_bytes() - 2 * 8 * n_cols * 4   # colsum out bufs
    # Per tile row: 2 inputs x 2 pipeline buffers, ~3 block-sized f32
    # temporaries in the body, and 2 lane-padded (tile,1) r output buffers.
    per_row = 4 * n_cols * itemsize + 3 * n_cols * 4 + 2 * 512
    tile = (max(budget // per_row, sub) // sub) * sub
    if tile >= n_rows:
        return n_rows            # single tile: block == full array is allowed
    return max(tile, sub)


def cosine_loss(target: jax.Array, output: jax.Array, reduce: bool = True,
                tile_rows=None) -> jax.Array:
    """Pallas TPU implementation of CosineLoss.forward(target, output)."""
    assert target.shape == output.shape and target.ndim == 2
    n, d = target.shape
    # The PyTorch sum(1)-without-keepdim broadcast only type-checks for N == D.
    assert n == d, f"CosineLoss broadcast requires square inputs, got {target.shape}"

    itemsize = jnp.dtype(target.dtype).itemsize
    sub = _sublane_multiple(itemsize)
    if tile_rows is None:
        tile_rows = _pick_tile_rows(n, d, itemsize)
    tile_rows = min(int(tile_rows), n)
    assert tile_rows == n or tile_rows % sub == 0, (tile_rows, sub)

    num_tiles = pl.cdiv(n, tile_rows)
    ragged = (n % tile_rows) != 0

    kernel = functools.partial(_cosine_loss_kernel, tile_rows=tile_rows,
                               n_rows=n, ragged=ragged)

    # VMEM footprint: inputs (2 arrays x 2 buffers) + in-body f32 temporaries
    # + colsum/r output pipeline buffers; give the compiler explicit headroom.
    block_bytes = tile_rows * d * itemsize
    vmem_needed = (4 * block_bytes + 3 * tile_rows * d * 4
                   + 2 * 8 * d * 4 + 2 * tile_rows * 512)
    vmem_limit = int(min(max(vmem_needed + (8 << 20), 32 << 20), 48 << 20))

    colsum_parts, r = pl.pallas_call(
        kernel,
        out_shape=(jax.ShapeDtypeStruct((8 * num_tiles, d), jnp.float32),
                   jax.ShapeDtypeStruct((n, 1), jnp.float32)),
        grid_spec=pltpu.PrefetchScalarGridSpec(
            num_scalar_prefetch=0,
            grid=(num_tiles,),
            in_specs=[
                pl.BlockSpec((tile_rows, d), lambda i: (i, 0)),
                pl.BlockSpec((tile_rows, d), lambda i: (i, 0)),
            ],
            out_specs=[
                pl.BlockSpec((8, d), lambda i: (i, 0)),
                pl.BlockSpec((tile_rows, 1), lambda i: (i, 0)),
            ],
        ),
        # Every grid step writes its own output blocks (no revisit), so the
        # row-tile axis is "parallel": free megacore sharding on v7x.
        compiler_params=pltpu.CompilerParams(
            dimension_semantics=("parallel",),
            vmem_limit_bytes=vmem_limit,
        ),
        # Advisory hint: clearly memory-bound custom call.
        cost_estimate=pl.CostEstimate(
            flops=6 * n * d,
            transcendentals=2 * n,
            bytes_accessed=2 * n * d * itemsize + 8 * num_tiles * d * 4 + n * 4,
        ),
    )(target, output)

    # O(N) epilogue in plain XLA (negligible next to the 2*N*D stream):
    # total = N - sum_j colsum[j] * r[j];  then mean() or sum() per `reduce`.
    colsum = jnp.sum(colsum_parts, axis=0)                 # (D,)
    s = jnp.dot(colsum, r[:, 0])                           # scalar (N == D)
    total = jnp.float32(n) - s
    return total / jnp.float32(n) if reduce else total


def _cosine_loss_ref(target, output, reduce=True):
    # Pure-JAX reference with the exact same (unusual but faithful) broadcast.
    tn = target / jnp.sqrt(jnp.sum(target**2, axis=1))
    on = output / jnp.sqrt(jnp.sum(output**2, axis=1))
    dot = 1.0 - jnp.sum(tn * on, axis=1)
    return jnp.mean(dot) if reduce else jnp.sum(dot)


if __name__ == "__main__":
    key = jax.random.PRNGKey(0)
    k1, k2, k3, k4 = jax.random.split(key, 4)

    # Small square case (N must equal D for the PyTorch broadcast), one tile.
    N = D = 16
    t1 = jax.random.normal(k1, (N, D), dtype=jnp.float32)
    o1 = jax.random.normal(k2, (N, D), dtype=jnp.float32)

    loss = cosine_loss(t1, o1, reduce=True)
    jax.block_until_ready(loss)
    ref = _cosine_loss_ref(t1, o1, reduce=True)
    assert jnp.allclose(loss, ref, rtol=1e-4, atol=1e-4), (loss, ref)

    loss_sum = cosine_loss(t1, o1, reduce=False)
    jax.block_until_ready(loss_sum)
    ref_sum = _cosine_loss_ref(t1, o1, reduce=False)
    assert jnp.allclose(loss_sum, ref_sum, rtol=1e-4, atol=1e-4), (loss_sum, ref_sum)

    # Multi-tile pipelined grid with a ragged (masked) last tile: 200 = 3*64+8.
    N2 = D2 = 200
    t2 = jax.random.normal(k3, (N2, D2), dtype=jnp.float32)
    o2 = jax.random.normal(k4, (N2, D2), dtype=jnp.float32)
    loss2 = cosine_loss(t2, o2, reduce=True, tile_rows=64)
    jax.block_until_ready(loss2)
    ref2 = _cosine_loss_ref(t2, o2, reduce=True)
    assert jnp.allclose(loss2, ref2, rtol=1e-4, atol=1e-4), (loss2, ref2)

    print("KERNEL_OK")
</pallas_src>

<mosaic_0001>
module attributes {stable_mosaic.version = 11 : i64} {
  func.func @_cosine_loss_kernel(%arg0: i32, %arg1: memref<16x16xf32, #tpu.memory_space<vmem>>, %arg2: memref<16x16xf32, #tpu.memory_space<vmem>>, %arg3: memref<8x16xf32, #tpu.memory_space<vmem>>, %arg4: memref<16x1xf32, #tpu.memory_space<vmem>>) attributes {dimension_semantics = [#tpu.dimension_semantics<parallel>], iteration_bounds = array<i64: 1>, scalar_prefetch = 0 : i64, scratch_operands = 0 : i64, tpu.core_type = #tpu.core_type<tc>, window_params = [{transform_indices = @transform_0, window_bounds = array<i64: 16, 16>}, {transform_indices = @transform_1, window_bounds = array<i64: 16, 16>}, {transform_indices = @transform_2, window_bounds = array<i64: 8, 16>}, {transform_indices = @transform_3, window_bounds = array<i64: 16, 1>}]} {
    %c0 = arith.constant 0 : index
    %c0_0 = arith.constant 0 : index
    %0 = vector.load %arg1[%c0, %c0_0] : memref<16x16xf32, #tpu.memory_space<vmem>>, vector<16x16xf32>
    %c0_1 = arith.constant 0 : index
    %c0_2 = arith.constant 0 : index
    %1 = vector.load %arg2[%c0_1, %c0_2] : memref<16x16xf32, #tpu.memory_space<vmem>>, vector<16x16xf32>
    %2 = arith.mulf %0, %1 : vector<16x16xf32>
    %cst = arith.constant dense<0.000000e+00> : vector<16xf32>
    %3 = vector.multi_reduction <add>, %2, %cst [0] : vector<16x16xf32> to vector<16xf32>
    %4 = vector.shape_cast %3 : vector<16xf32> to vector<1x16xf32>
    %5 = tpu.iota {dimensions = array<i32: 0>} : vector<8x16xi32>
    %c0_i32 = arith.constant 0 : i32
    %6 = vector.broadcast %c0_i32 : i32 to vector<8x16xi32>
    %7 = arith.cmpi eq, %5, %6 : vector<8x16xi32>
    %cst_3 = arith.constant 0.000000e+00 : f32
    %8 = vector.shape_cast %4 : vector<1x16xf32> to vector<1x16xf32>
    %9 = vector.broadcast %8 : vector<1x16xf32> to vector<8x16xf32>
    %10 = vector.broadcast %cst_3 : f32 to vector<8x16xf32>
    %11 = arith.select %7, %9, %10 : vector<8x16xi1>, vector<8x16xf32>
    %c0_4 = arith.constant 0 : index
    %c0_5 = arith.constant 0 : index
    %12 = vector.load %arg3[%c0_4, %c0_5] : memref<8x16xf32, #tpu.memory_space<vmem>>, vector<8x16xf32>
    tpu.vector_store %arg3[%c0_4, %c0_5], %11 {strides = array<i32>} : memref<8x16xf32, #tpu.memory_space<vmem>>, vector<8x16xf32>,
    %13 = arith.mulf %0, %0 : vector<16x16xf32>
    %cst_6 = arith.constant dense<0.000000e+00> : vector<16xf32>
    %14 = vector.multi_reduction <add>, %13, %cst_6 [1] : vector<16x16xf32> to vector<16xf32>
    %15 = vector.shape_cast %14 : vector<16xf32> to vector<16x1xf32>
    %16 = arith.mulf %1, %1 : vector<16x16xf32>
    %cst_7 = arith.constant dense<0.000000e+00> : vector<16xf32>
    %17 = vector.multi_reduction <add>, %16, %cst_7 [1] : vector<16x16xf32> to vector<16xf32>
    %18 = vector.shape_cast %17 : vector<16xf32> to vector<16x1xf32>
    %19 = math.rsqrt %15 : vector<16x1xf32>
    %20 = math.rsqrt %18 : vector<16x1xf32>
    %21 = arith.mulf %19, %20 : vector<16x1xf32>
    %c0_8 = arith.constant 0 : index
    %c0_9 = arith.constant 0 : index
    %22 = vector.load %arg4[%c0_8, %c0_9] : memref<16x1xf32, #tpu.memory_space<vmem>>, vector<16x1xf32>
    tpu.vector_store %arg4[%c0_8, %c0_9], %21 {strides = array<i32>} : memref<16x1xf32, #tpu.memory_space<vmem>>, vector<16x1xf32>,
    return
  }
  func.func @transform_0(%arg0: i32) -> (i32, i32) {
    %c0_i32 = arith.constant 0 : i32
    %c0_i32_0 = arith.constant 0 : i32
    return %arg0, %c0_i32 : i32, i32
  }
  func.func @transform_1(%arg0: i32) -> (i32, i32) {
    %c0_i32 = arith.constant 0 : i32
    %c0_i32_0 = arith.constant 0 : i32
    return %arg0, %c0_i32 : i32, i32
  }
  func.func @transform_2(%arg0: i32) -> (i32, i32) {
    %c0_i32 = arith.constant 0 : i32
    %c0_i32_0 = arith.constant 0 : i32
    return %arg0, %c0_i32 : i32, i32
  }
  func.func @transform_3(%arg0: i32) -> (i32, i32) {
    %c0_i32 = arith.constant 0 : i32
    %c0_i32_0 = arith.constant 0 : i32
    return %arg0, %c0_i32 : i32, i32
  }
}

</mosaic_0001>

<bundles_post_ra>
// kernel: tpu_custom_call.1
= control target key start
LH: loop header
LB: loop body
LE: loop exit
PB: predicated region body
PF: predicated region fallthrough
CT: control target
= control target key end

     0   :  { %9 = vsyncpa [#allocation3], 0  ;;  %s290_s0 = inlined_call_operand.hbm [shape: f32[16,16], index: 0, kind: input, shape index: {}]   ;;  %s291_s1 = inlined_call_operand.hbm [shape: f32[16,16], index: 1, kind: input, shape index: {}]   ;;  %s292_s2 = inlined_call_operand.hbm [shape: f32[8,16], index: 2, kind: output, shape index: {0}]   ;;  %s293_s3 = inlined_call_operand.vmem [shape: f32[16,1], index: 3, kind: output, shape index: {1}]  }
   0x1   :  { %10 = vsyncpa [#allocation6], 0 }
   0x2   :  { %11 = vsyncpa [#allocation4], 0  ;;  %s16_s14 = sshll.u32 %s290_s0, 4  ;;  %s241_s15 = smov [#allocation2]   ;;  %s17_s14 = int_to_ptr.hbm [resolvable:$true] %s16_s14 }
   0x3   :  { %s18_s16 = sshll.u32 %s241_s15, 4  ;;  %s29_s19 = sshll.u32 %s291_s1, 4  ;;  %s19_s16 = int_to_ptr.vmem [resolvable:$true] %s18_s16  ;;  %s30_s19 = int_to_ptr.hbm [resolvable:$true] %s29_s19 }
   0x4   :  { %s242_s20 = smov 128   ;;  %s243_s21 = smov 8  }
   0x5   :  { %24 = dma.hbm_to_vmem [thread:$0]  %s17_s14, 256, %s19_s16, [#allocation3], %s242_s20, %s242_s20, %s243_s21  }
   0x6   :  { %s244_s22 = smov [#allocation5]  }
   0x7   :  { %s31_s23 = sshll.u32 %s244_s22, 4  ;;  %s32_s23 = int_to_ptr.vmem [resolvable:$true] %s31_s23 }
   0x8   :  { %37 = dma.hbm_to_vmem [thread:$0]  %s30_s19, 256, %s32_s23, [#allocation6], %s242_s20, %s242_s20, %s243_s21  }
   0x9   :  { %235 = dma.done.wait [#allocation3], 256  }
   0xa   :  { %236 = vsyncadd [#allocation3], 4294967040 }
   0xb   :  { %237 = dma.done.wait [#allocation6], 256  }
   0xc   :  { %238 = vsyncadd [#allocation6], 4294967040  ;;  %v48_v0 = vld [vmem:[#allocation5] sm:$0xff]  ;;  %vm52_vm0 = vcmask 130048   ;;  %v46_v1 = vld [vmem:[#allocation2] sm:$0xff]  ;;  %v62_v21 = vlaneseq  ;;  %s245_s0 = smov [#allocation7]  }
   0xd   :  { %v75_v2 = vmul.f32 %v48_v0, %v48_v0  ;;  %v67_v3 = vmul.f32 %v46_v1, %v46_v1  ;;  %v50_v4 = vmul.f32 %v48_v0, %v46_v1  ;;  %v49_v5 = vld [vmem:[#allocation5 + $0x8] sm:$0xff]  ;;  %v47_v6 = vld [vmem:[#allocation2 + $0x8] sm:$0xff]  ;;  %s133_s1 = sshll.u32 %s245_s0, 4  ;;  %s135_s26 = sshll.u32 %s292_s2, 4  ;;  %vm125_vm8 = vcmask 7168   ;;  %s134_s1 = int_to_ptr.vmem [resolvable:$true] %s133_s1  ;;  %s136_s26 = int_to_ptr.hbm [resolvable:$true] %s135_s26 }
   0xe   :  { %v51_v7 = vmul.f32 %v49_v5, %v47_v6  ;;  %v76_v12 = vmul.f32 %v49_v5, %v49_v5  ;;  %v68_v13 = vmul.f32 %v47_v6, %v47_v6  ;;  %v63_v23 = vshrl.u32 %v62_v21, 7 }
   0xf   :  { %v77_v8 = vsel %vm52_vm0, %v75_v2, 0.0  ;;  %v69_v9 = vsel %vm52_vm0, %v67_v3, 0.0  ;;  %v53_v10 = vsel %vm52_vm0, %v50_v4, 0.0 }
  0x10   :  { %78 = vadd.xlane.f32.xlu1 %v77_v8  ;;  %70 = vadd.xlane.f32.xlu0 %v69_v9  ;;  %v54_v11 = vsel %vm52_vm0, %v51_v7, 0.0  ;;  %v80_v15 = vsel %vm52_vm0, %v76_v12, 0.0  ;;  %v72_v16 = vsel %vm52_vm0, %v68_v13, 0.0  ;;  %vm64_vm1 = vcmp.eq.s32.totalorder %v63_v23, 0 }
  0x11   :  { %v55_v14 = vadd.f32 %v54_v11, %v53_v10 }
  0x13   :  { %v56_v17 = vrot.slane %v55_v14, 4 }
  0x15   :  { %v57_v18 = vadd.f32 %v56_v17, %v55_v14 }
  0x17   :  { %v58_v19 = vrot.slane %v57_v18, 2 }
  0x18   :  { %81 = vadd.xlane.f32.xlu1 %v80_v15  ;;  %73 = vadd.xlane.f32.xlu0 %v72_v16 }
  0x19   :  { %v59_v20 = vadd.f32 %v58_v19, %v57_v18 }
  0x1b   :  { %v60_v22 = vrot.slane %v59_v20, 1 }
  0x1d   :  { %v61_v24 = vadd.f32 %v60_v22, %v59_v20 }
  0x1f   :  { %v65_v25 = vsel %vm64_vm1, %v61_v24, 0.0 }
  0x20   :  { %66 = vst.msk [vmem:[#allocation7] sm:$0xff] %vm52_vm0, %v65_v25 }
  0x21   :  { %138 = dma.vmem_to_hbm [thread:$0]  %s134_s1, 128, %s136_s26, [#allocation4]  }
  0x83   :  { %v79_v26 = vpop.xlane.xlu1 %78  ;;  %v71_v27 = vpop.xlane.xlu0 %70 }
  0x84   :  { %155 = vrsqrt.f32 %v79_v26  ;;  %vm109_vm4 = vweird.f32 %v79_v26  ;;  %vm89_vm6 = vweird.f32 %v71_v27 }
  0x85   :  { %157 = vrsqrt.f32 %v71_v27 }
  0x8a   :  { %v156_v28 = vpop.eup %155 }
  0x8b   :  { %v158_v29 = vpop.eup %157  ;;  %v104_v30 = vmul.f32 %v156_v28, %v79_v26  ;;  %v82_v31 = vpop.xlane.xlu1 %81  ;;  %vm110_vm2 = vweird.f32 %v156_v28 }
  0x8c   :  { %v74_v32 = vpop.xlane.xlu0 %73  ;;  %v84_v33 = vmul.f32 %v158_v29, %v71_v27  ;;  %159 = vrsqrt.f32 %v82_v31  ;;  %vm90_vm3 = vweird.f32 %v158_v29  ;;  %vm111_vm5 = vmor %vm109_vm4, %vm110_vm2  ;;  %vm119_vm11 = vweird.f32 %v82_v31 }
  0x8d   :  { %v105_v34 = vmul.f32 %v156_v28, %v104_v30  ;;  %161 = vrsqrt.f32 %v74_v32  ;;  %vm91_vm7 = vmor %vm89_vm6, %vm90_vm3  ;;  %vm99_vm13 = vweird.f32 %v74_v32 }
  0x8e   :  { %v85_v35 = vmul.f32 %v158_v29, %v84_v33 }
  0x8f   :  { %v106_v36 = vmul.f32 0.5, %v105_v34 }
  0x90   :  { %v86_v37 = vmul.f32 0.5, %v85_v35 }
  0x91   :  { %v107_v38 = vsub.f32 1.5, %v106_v36 }
  0x92   :  { %v160_v39 = vpop.eup %159  ;;  %v87_v40 = vsub.f32 1.5, %v86_v37 }
  0x93   :  { %v162_v41 = vpop.eup %161  ;;  %v108_v42 = vmul.f32 %v156_v28, %v107_v38  ;;  %v114_v43 = vmul.f32 %v160_v39, %v82_v31  ;;  %vm120_vm9 = vweird.f32 %v160_v39 }
  0x94   :  { %v88_v44 = vmul.f32 %v158_v29, %v87_v40  ;;  %v94_v45 = vmul.f32 %v162_v41, %v74_v32  ;;  %vm100_vm10 = vweird.f32 %v162_v41  ;;  %vm121_vm12 = vmor %vm119_vm11, %vm120_vm9 }
  0x95   :  { %v112_v46 = vsel %vm111_vm5, %v156_v28, %v108_v42  ;;  %v115_v47 = vmul.f32 %v160_v39, %v114_v43  ;;  %vm101_vm14 = vmor %vm99_vm13, %vm100_vm10 }
  0x96   :  { %v92_v48 = vsel %vm91_vm7, %v158_v29, %v88_v44  ;;  %v95_v49 = vmul.f32 %v162_v41, %v94_v45 }
  0x97   :  { %v123_v50 = vmul.f32 %v112_v46, %v92_v48  ;;  %v116_v51 = vmul.f32 0.5, %v115_v47 }
  0x98   :  { %v96_v52 = vmul.f32 0.5, %v95_v49 }
  0x99   :  { %126 = vst.msk [vmem:[%s293_s3] sm:$0xff] %vm125_vm8, %v123_v50  ;;  %v117_v53 = vsub.f32 1.5, %v116_v51 }
  0x9a   :  { %v97_v54 = vsub.f32 1.5, %v96_v52 }
  0x9b   :  { %v118_v55 = vmul.f32 %v160_v39, %v117_v53 }
  0x9c   :  { %v98_v56 = vmul.f32 %v162_v41, %v97_v54 }
  0x9d   :  { %v122_v57 = vsel %vm121_vm12, %v160_v39, %v118_v55 }
  0x9e   :  { %v102_v58 = vsel %vm101_vm14, %v162_v41, %v98_v56 }
  0x9f   :  { %v124_v59 = vmul.f32 %v122_v57, %v102_v58 }
  0xa1   :  { %127 = vst.msk [vmem:[%s293_s3 + $0x8] sm:$0xff] %vm125_vm8, %v124_v59 }
  0xa2   :  { %239 = dma.done.wait [#allocation4], 128  }
  0xa3   :  { %240 = vsyncadd [#allocation4], 4294967168 }
  0xa4   :  { %147 = vsyncpa [#allocation3], 1 }
  0xa5   :  { %148 = vsyncpa [#allocation6], 1 }
  0xa6   :  { %149 = vsyncpa [#allocation4], 1 }

</bundles_post_ra>
